<compile_context>
chip_gen: v6e
topology: v6e:2x2x1
jax: 0.10.0
libtpu: 0.0.40
codegen_flags: <defaults>
</compile_context>

<pallas_src>
import functools

import jax
import jax.numpy as jnp
from jax import lax
from jax.experimental import pallas as pl
from jax.experimental.pallas import tpu as pltpu


def _round_up(x, m):
    return -(-x // m) * m


def _vmem_capacity_bytes():
    """Generation-aware VMEM capacity (v5e/v6e: 128 MiB, v7x: 64 MiB per TC)."""
    try:
        cap = getattr(pltpu.get_tpu_info(), "vmem_capacity_bytes", None)
        if cap:
            return int(cap)
    except Exception:
        pass
    try:
        kind = jax.devices()[0].device_kind.lower()
        if "v5" in kind or "v6" in kind:
            return 128 * 1024 * 1024
    except Exception:
        pass
    return 64 * 1024 * 1024  # conservative default (v7x per-TensorCore VMEM)


def _focal_loss_kernel(logits_ref, targets_ref, out_ref,
                       *, n, block_rows, blocks_per_split, mask_needed):
    split = pl.program_id(0)   # "parallel" axis (sharded across TCs on v7x)
    i = pl.program_id(1)       # "arbitrary" reduction axis within a split

    # Per-split partial-sum block is resident across the inner axis: zero once.
    @pl.when(i == 0)
    def _init():
        out_ref[...] = jnp.zeros_like(out_ref)

    x = logits_ref[...].astype(jnp.float32)          # (BN, C) cast inside VMEM
    t = targets_ref[...]                             # (BN, 1) int32

    # Numerically stable per-row logsumexp (all 2-D keepdims: no 1-D relayouts).
    m = jnp.max(x, axis=-1, keepdims=True)                            # (BN, 1)
    lse = jnp.log(jnp.sum(jnp.exp(x - m), axis=-1, keepdims=True))    # (BN, 1)

    # x[row, target[row]] via broadcast-compare against a lane iota (no gather).
    col = lax.broadcasted_iota(jnp.int32, x.shape, 1)                 # (BN, C)
    x_t = jnp.sum(jnp.where(col == t, x, 0.0), axis=-1, keepdims=True)

    # nll = -log_softmax(x)[target] = lse + m - x[target]
    nll = lse + m - x_t                                               # (BN, 1)

    def _accumulate(vals):
        # Scalar partial broadcast-added into the resident (8,128) output block.
        out_ref[...] = out_ref[...] + jnp.sum(vals)

    if mask_needed:
        blk = split * blocks_per_split + i            # un-clamped logical block
        is_tail = (blk + 1) * block_rows > n          # partial or duplicated blk

        @pl.when(jnp.logical_not(is_tail))
        def _steady():                                # steady-state: no mask ops
            _accumulate(nll)

        @pl.when(is_tail)
        def _tail():                                  # mask rows past true N
            row = lax.broadcasted_iota(jnp.int32, nll.shape, 0) + blk * block_rows
            _accumulate(jnp.where(row < n, nll, 0.0))
    else:
        _accumulate(nll)


def focal_loss(logits, targets, alpha=1.0, gamma=2.0, block_rows=None,
               num_splits=None):
    """logits: (N, C) float (any float dtype), targets: (N,) int class indices.

    Returns a scalar f32 focal loss matching the PyTorch module.
    """
    n, c = logits.shape
    targets2d = targets.astype(jnp.int32).reshape(n, 1)

    vmem_cap = _vmem_capacity_bytes()
    vmem_limit = vmem_cap // 2                        # scoped limit with headroom

    if block_rows is None:
        # Lane-padded VMEM accounting: a (BN, C) tile occupies round_up(C,128)
        # lanes per row in VMEM; the (BN,1) int32 target tile pads to 128 lanes.
        itemsize = jnp.dtype(logits.dtype).itemsize
        padded_c = _round_up(max(c, 1), 128)
        row_bytes = (2 * padded_c * itemsize          # double-buffered logits tile
                     + 2 * 128 * 4                    # double-buffered target tile
                     + 2 * padded_c * 4)              # f32 working copies (cast/exp)
        usable = (vmem_limit * 3) // 4                # leave slack for compiler temps
        block_rows = max(8, (usable // row_bytes) // 8 * 8)
    if n <= block_rows:
        block_rows = n                                # single block == full dim

    num_blocks = pl.cdiv(n, block_rows)
    if num_splits is None:
        # Two partial sums so v7x's two TensorCores both work; neutral on 1-TC
        # v5e/v6e (just one extra tiny grid entry).
        num_splits = 2
    num_splits = max(1, min(num_splits, num_blocks))
    blocks_per_split = pl.cdiv(num_blocks, num_splits)
    mask_needed = (num_splits * blocks_per_split * block_rows) != n
    last_block = num_blocks - 1

    def _block_index(s, i):
        # Clamp fully-out-of-range duplicate tail blocks onto the last real
        # block; their rows are zero-masked inside the kernel.
        return jnp.minimum(s * blocks_per_split + i, last_block)

    kernel = functools.partial(
        _focal_loss_kernel, n=n, block_rows=block_rows,
        blocks_per_split=blocks_per_split, mask_needed=mask_needed)

    partials = pl.pallas_call(
        kernel,
        out_shape=jax.ShapeDtypeStruct((num_splits * 8, 128), jnp.float32),
        grid=(num_splits, blocks_per_split),
        in_specs=[
            pl.BlockSpec((block_rows, c), lambda s, i: (_block_index(s, i), 0)),
            pl.BlockSpec((block_rows, 1), lambda s, i: (_block_index(s, i), 0)),
        ],
        # One (8,128)-aligned VMEM block per split; every element of a block
        # holds that split's partial sum.
        out_specs=pl.BlockSpec((8, 128), lambda s, i: (s, 0)),
        compiler_params=pltpu.CompilerParams(
            dimension_semantics=("parallel", "arbitrary"),
            vmem_limit_bytes=int(vmem_limit),
        ),
    )(logits, targets2d)                              # no wrapper upcast

    # Tiny finalize on the per-split partials in the wrapper.
    total = jnp.sum(partials[::8, 0])                 # one value per split
    ce = total / jnp.float32(n)
    pt = jnp.exp(-ce)
    one_minus_pt = jnp.float32(1.0) - pt
    if float(gamma).is_integer():
        mod = one_minus_pt ** int(gamma)              # gamma=2 -> single multiply
    else:
        mod = one_minus_pt ** jnp.float32(gamma)
    return jnp.float32(alpha) * mod * ce


def focal_loss_ref(logits, targets, alpha=1.0, gamma=2.0):
    """Pure-JAX reference matching torch.nn.CrossEntropyLoss + focal scaling."""
    logp = jax.nn.log_softmax(logits.astype(jnp.float32), axis=-1)
    nll = -jnp.take_along_axis(logp, targets[:, None].astype(jnp.int32), axis=-1)[:, 0]
    ce = jnp.mean(nll)
    pt = jnp.exp(-ce)
    return alpha * (1.0 - pt) ** gamma * ce


if __name__ == "__main__":
    key = jax.random.PRNGKey(0)
    k1, k2, k3, k4 = jax.random.split(key, 4)

    # 1) gridded path with a partial last block and the 2-way split
    #    (N=12, BN=8 -> 2 blocks, 2 splits, masked tail rows)
    N, C = 12, 16
    logits = jax.random.normal(k1, (N, C), dtype=jnp.float32)
    targets = jax.random.randint(k2, (N,), 0, C, dtype=jnp.int32)
    out_grid = jax.block_until_ready(focal_loss(logits, targets, block_rows=8))
    ref = focal_loss_ref(logits, targets)
    assert jnp.allclose(out_grid, ref, atol=1e-5, rtol=1e-5), (out_grid, ref)

    # 2) default tile choice (single block covers N)
    out_single = jax.block_until_ready(focal_loss(logits, targets))
    assert jnp.allclose(out_single, ref, atol=1e-5, rtol=1e-5), (out_single, ref)

    # 3) bf16 inputs streamed as-is (no wrapper upcast), cast to f32 in-kernel
    logits_bf16 = logits.astype(jnp.bfloat16)
    out_bf16 = jax.block_until_ready(focal_loss(logits_bf16, targets, block_rows=8))
    ref_bf16 = focal_loss_ref(logits_bf16, targets)
    assert jnp.allclose(out_bf16, ref_bf16, atol=1e-5, rtol=1e-5), (out_bf16, ref_bf16)

    # 4) multi-block split path with clamped/zero-masked duplicate tail blocks
    #    (N=1200, BN=512 -> 3 blocks over 2 splits of 2 -> one duplicate block)
    N2, C2 = 1200, 16
    logits2 = jax.random.normal(k3, (N2, C2), dtype=jnp.float32)
    targets2 = jax.random.randint(k4, (N2,), 0, C2, dtype=jnp.int32)
    out2 = jax.block_until_ready(focal_loss(logits2, targets2, block_rows=512))
    ref2 = focal_loss_ref(logits2, targets2)
    assert jnp.allclose(out2, ref2, atol=1e-5, rtol=1e-5), (out2, ref2)

    # TODO(synk): torch ignore_index / out-of-range targets are not handled
    # (they would contribute lse + m to the sum instead of being excluded).
    print("KERNEL_OK")
</pallas_src>

<mosaic_0001>
module attributes {stable_mosaic.version = 11 : i64} {
  func.func @_focal_loss_kernel(%arg0: i32, %arg1: i32, %arg2: memref<8x16xf32, #tpu.memory_space<vmem>>, %arg3: memref<8x1xi32, #tpu.memory_space<vmem>>, %arg4: memref<8x128xf32, #tpu.memory_space<vmem>>) attributes {dimension_semantics = [#tpu.dimension_semantics<parallel>, #tpu.dimension_semantics<arbitrary>], iteration_bounds = array<i64: 2, 1>, scalar_prefetch = 0 : i64, scratch_operands = 0 : i64, tpu.core_type = #tpu.core_type<tc>, window_params = [{transform_indices = @transform_0, window_bounds = array<i64: 8, 16>}, {transform_indices = @transform_1, window_bounds = array<i64: 8, 1>}, {transform_indices = @transform_2, window_bounds = array<i64: 8, 128>}]} {
    %c0_i32 = arith.constant 0 : i32
    %0 = arith.cmpi eq, %arg1, %c0_i32 : i32
    %1 = arith.extui %0 : i1 to i32
    %c0_i32_0 = arith.constant 0 : i32
    %2 = arith.cmpi ne, %1, %c0_i32_0 : i32
    scf.if %2 {
      %cst_10 = arith.constant 0.000000e+00 : f32
      %32 = vector.broadcast %cst_10 : f32 to vector<8x128xf32>
      %c0_11 = arith.constant 0 : index
      %c0_12 = arith.constant 0 : index
      %33 = vector.load %arg4[%c0_11, %c0_12] : memref<8x128xf32, #tpu.memory_space<vmem>>, vector<8x128xf32>
      tpu.vector_store %arg4[%c0_11, %c0_12], %32 {strides = array<i32>} : memref<8x128xf32, #tpu.memory_space<vmem>>, vector<8x128xf32>,
    } else {
    }
    %c0 = arith.constant 0 : index
    %c0_1 = arith.constant 0 : index
    %3 = vector.load %arg2[%c0, %c0_1] : memref<8x16xf32, #tpu.memory_space<vmem>>, vector<8x16xf32>
    %c0_2 = arith.constant 0 : index
    %c0_3 = arith.constant 0 : index
    %4 = vector.load %arg3[%c0_2, %c0_3] : memref<8x1xi32, #tpu.memory_space<vmem>>, vector<8x1xi32>
    %cst = arith.constant dense<0xFF800000> : vector<8xf32>
    %5 = vector.multi_reduction <maximumf>, %3, %cst [1] : vector<8x16xf32> to vector<8xf32>
    %6 = vector.shape_cast %5 : vector<8xf32> to vector<8x1xf32>
    %7 = vector.broadcast %6 : vector<8x1xf32> to vector<8x16xf32>
    %8 = arith.subf %3, %7 : vector<8x16xf32>
    %9 = math.exp %8 : vector<8x16xf32>
    %cst_4 = arith.constant dense<0.000000e+00> : vector<8xf32>
    %10 = vector.multi_reduction <add>, %9, %cst_4 [1] : vector<8x16xf32> to vector<8xf32>
    %11 = vector.shape_cast %10 : vector<8xf32> to vector<8x1xf32>
    %12 = math.log %11 : vector<8x1xf32>
    %13 = tpu.iota {dimensions = array<i32: 1>} : vector<8x16xi32>
    %14 = vector.broadcast %4 : vector<8x1xi32> to vector<8x16xi32>
    %15 = arith.cmpi eq, %13, %14 : vector<8x16xi32>
    %cst_5 = arith.constant 0.000000e+00 : f32
    %16 = vector.broadcast %cst_5 : f32 to vector<8x16xf32>
    %17 = arith.select %15, %3, %16 : vector<8x16xi1>, vector<8x16xf32>
    %cst_6 = arith.constant dense<0.000000e+00> : vector<8xf32>
    %18 = vector.multi_reduction <add>, %17, %cst_6 [1] : vector<8x16xf32> to vector<8xf32>
    %19 = vector.shape_cast %18 : vector<8xf32> to vector<8x1xf32>
    %20 = arith.addf %12, %6 : vector<8x1xf32>
    %21 = arith.subf %20, %19 : vector<8x1xf32>
    %c1_i32 = arith.constant 1 : i32
    %22 = arith.muli %arg0, %c1_i32 : i32
    %23 = arith.addi %22, %arg1 : i32
    %c1_i32_7 = arith.constant 1 : i32
    %24 = arith.addi %23, %c1_i32_7 : i32
    %c8_i32 = arith.constant 8 : i32
    %25 = arith.muli %24, %c8_i32 : i32
    %c12_i32 = arith.constant 12 : i32
    %26 = arith.cmpi sgt, %25, %c12_i32 : i32
    %true = arith.constant true
    %27 = arith.xori %26, %true : i1
    %28 = arith.extui %27 : i1 to i32
    %c0_i32_8 = arith.constant 0 : i32
    %29 = arith.cmpi ne, %28, %c0_i32_8 : i32
    scf.if %29 {
      %c0_10 = arith.constant 0 : index
      %c0_11 = arith.constant 0 : index
      %32 = vector.load %arg4[%c0_10, %c0_11] : memref<8x128xf32, #tpu.memory_space<vmem>>, vector<8x128xf32>
      %33 = vector.shape_cast %21 : vector<8x1xf32> to vector<1x8x1xf32>
      %cst_12 = arith.constant dense<0.000000e+00> : vector<1xf32>
      %34 = vector.multi_reduction <add>, %33, %cst_12 [1, 2] : vector<1x8x1xf32> to vector<1xf32>
      %35 = vector.shape_cast %34 : vector<1xf32> to vector<1x1x1xf32>
      %36 = vector.extract %35[0, 0, 0] : f32 from vector<1x1x1xf32>
      %37 = vector.broadcast %36 : f32 to vector<8x128xf32>
      %38 = arith.addf %32, %37 : vector<8x128xf32>
      %c0_13 = arith.constant 0 : index
      %c0_14 = arith.constant 0 : index
      %39 = vector.load %arg4[%c0_13, %c0_14] : memref<8x128xf32, #tpu.memory_space<vmem>>, vector<8x128xf32>
      tpu.vector_store %arg4[%c0_13, %c0_14], %38 {strides = array<i32>} : memref<8x128xf32, #tpu.memory_space<vmem>>, vector<8x128xf32>,
    } else {
    }
    %30 = arith.extui %26 : i1 to i32
    %c0_i32_9 = arith.constant 0 : i32
    %31 = arith.cmpi ne, %30, %c0_i32_9 : i32
    scf.if %31 {
      %32 = tpu.iota {dimensions = array<i32: 0>} : vector<8x1xi32>
      %c8_i32_10 = arith.constant 8 : i32
      %33 = arith.muli %23, %c8_i32_10 : i32
      %34 = vector.broadcast %33 : i32 to vector<8x1xi32>
      %35 = arith.addi %32, %34 : vector<8x1xi32>
      %c12_i32_11 = arith.constant 12 : i32
      %36 = vector.broadcast %c12_i32_11 : i32 to vector<8x1xi32>
      %37 = arith.cmpi slt, %35, %36 : vector<8x1xi32>
      %cst_12 = arith.constant 0.000000e+00 : f32
      %38 = vector.broadcast %cst_12 : f32 to vector<8x1xf32>
      %39 = arith.select %37, %21, %38 : vector<8x1xi1>, vector<8x1xf32>
      %c0_13 = arith.constant 0 : index
      %c0_14 = arith.constant 0 : index
      %40 = vector.load %arg4[%c0_13, %c0_14] : memref<8x128xf32, #tpu.memory_space<vmem>>, vector<8x128xf32>
      %41 = vector.shape_cast %39 : vector<8x1xf32> to vector<1x8x1xf32>
      %cst_15 = arith.constant dense<0.000000e+00> : vector<1xf32>
      %42 = vector.multi_reduction <add>, %41, %cst_15 [1, 2] : vector<1x8x1xf32> to vector<1xf32>
      %43 = vector.shape_cast %42 : vector<1xf32> to vector<1x1x1xf32>
      %44 = vector.extract %43[0, 0, 0] : f32 from vector<1x1x1xf32>
      %45 = vector.broadcast %44 : f32 to vector<8x128xf32>
      %46 = arith.addf %40, %45 : vector<8x128xf32>
      %c0_16 = arith.constant 0 : index
      %c0_17 = arith.constant 0 : index
      %47 = vector.load %arg4[%c0_16, %c0_17] : memref<8x128xf32, #tpu.memory_space<vmem>>, vector<8x128xf32>
      tpu.vector_store %arg4[%c0_16, %c0_17], %46 {strides = array<i32>} : memref<8x128xf32, #tpu.memory_space<vmem>>, vector<8x128xf32>,
    } else {
    }
    return
  }
  func.func @transform_0(%arg0: i32, %arg1: i32) -> (i32, i32) {
    %c1_i32 = arith.constant 1 : i32
    %0 = arith.muli %arg0, %c1_i32 : i32
    %1 = arith.addi %0, %arg1 : i32
    %c1_i32_0 = arith.constant 1 : i32
    %2 = arith.minsi %1, %c1_i32_0 : i32
    %c0_i32 = arith.constant 0 : i32
    %c0_i32_1 = arith.constant 0 : i32
    return %2, %c0_i32 : i32, i32
  }
  func.func @transform_1(%arg0: i32, %arg1: i32) -> (i32, i32) {
    %c1_i32 = arith.constant 1 : i32
    %0 = arith.muli %arg0, %c1_i32 : i32
    %1 = arith.addi %0, %arg1 : i32
    %c1_i32_0 = arith.constant 1 : i32
    %2 = arith.minsi %1, %c1_i32_0 : i32
    %c0_i32 = arith.constant 0 : i32
    %c0_i32_1 = arith.constant 0 : i32
    return %2, %c0_i32 : i32, i32
  }
  func.func @transform_2(%arg0: i32, %arg1: i32) -> (i32, i32) {
    %c0_i32 = arith.constant 0 : i32
    %c0_i32_0 = arith.constant 0 : i32
    return %arg0, %c0_i32 : i32, i32
  }
}

</mosaic_0001>

<bundles_post_ra>
// kernel: tpu_custom_call.1
= control target key start
LH: loop header
LB: loop body
LE: loop exit
PB: predicated region body
PF: predicated region fallthrough
CT: control target
= control target key end

     0   :  { %7 = vsyncpa [#allocation3], 0  ;;  %s690_s0 = inlined_call_operand.vmem [shape: f32[12,16], index: 0, kind: input, shape index: {}]   ;;  %s691_s1 = inlined_call_operand.vmem [shape: s32[12,1], index: 1, kind: input, shape index: {}]   ;;  %s692_s2 = inlined_call_operand.hbm [shape: f32[16,128], index: 2, kind: output, shape index: {}]  }
   0x1   :  { %9 = vsyncpa [#allocation3 + $0x1], 0  ;;  %s568_s9 = smov 0   ;;  %s570_s10 = smov 0  }
   0x2   :  { %s572_s11 = smov 0   ;;  %s574_s12 = smov 0  }
   0x3   :  { %s576_s13 = smov 0   ;;  %s578_s14 = smov 0  }
   0x4 LB: > { %s382_s15 = sadd.s32 4294967295, %s548_s14   ;;  %s383_s16 = sadd.s32 4294967294, %s548_s14   ;;  %s548_s14 = sphi %s578_s14, %s15_s14   ;;  %s544_s13 = sphi %s576_s13, %s699_s13   ;;  %s540_s12 = sphi %s574_s12, %s698_s12   ;;  %s536_s11 = sphi %s572_s11, %s697_s11   ;;  %s532_s10 = sphi %s570_s10, %s696_s10   ;;  %s528_s9 = sphi %s568_s9, %s695_s9  }
   0x5   : > { %s27_s17 = sadd.s32 1, %s544_s13  ;;  %s98_s18 = sadd.s32 1, %s536_s11 }
   0x6   : > { %p29_p0 = scmp.ge.s32.totalorder %s27_s17, 2  ;;  %p108_p1 = scmp.ne.s32.totalorder %s536_s11, %s532_s10 }
   0x7   : > { %p109_p2 = scmp.eq.s32.totalorder %s382_s15, 1  ;;  %p114_p3 = scmp.ne.s32.totalorder %s532_s10, %s528_s9 }
   0x8   : > { %s701_s17 = smov (%p29_p0, %s27_s17), 0  ;;  %p115_p5 = scmp.eq.s32.totalorder %s383_s16, 1 }
   0x9   : > { %p608_p4 = por %p109_p2, %p108_p1  ;;  %s95_s20 = ssub.s32 %s544_s13, %s701_s17 }
   0xa   : > { %p386_p6 = scmp.ge.s32.totalorder %s548_s14, 1  ;;  %p96_p7 = scmp.eq.s32.totalorder %s95_s20, 0 }
   0xb   : > { %p615_p8 = por %p115_p5, %p114_p3  ;;  %p159_p9 = scmp.lt.s32.totalorder %s548_s14, 3 }
   0xc   : > { %s621_s22 = scalar_select %p96_p7, %s536_s11, %s98_s18  }
   0xd   : > { %p160_p10 = pnand %p386_p6, %p159_p9 }
   0xe   : > { %p191_p11 = scmp.lt.s32.totalorder (!%p160_p10), %s540_s12, 1  ;;  %s187_s3 = sand.u32 (!%p160_p10), 1, %s532_s10  }
   0xf   : > { %163 = sbr.rel (%p160_p10) target bundleno = 788 (0x314), region = 28  ;;  %s387_s4 = sshll.u32 (!%p160_p10), %s187_s3, 3 }
  0x10   : > { %s404_s5 = sshll.u32 (!%p160_p10), %s540_s12, 3  ;;  %s638_s6 = scalar_lea.vmem (!%p160_p10), [#allocation2], %s387_s4 }
  0x11   : > { %s405_s7 = sadd.s32 (!%p160_p10), 8, %s404_s5 }
  0x12   : > { %p397_p12 = scmp.gt.s32.totalorder (!%p160_p10), %s405_s7, 12 }
  0x14   : > { %v550_v0 = vmov 0   ;;  %s192_s23 = scalar_select %p191_p11, %s540_s12, 1  ;;  %vm217_vm0 = vcmask 130048   ;;  %v229_v7 = vlaneseq  ;;  %v551_v14 = vmov 0.0  }
  0x15   : > { %467 = vset.pattern.permute.xlu0 %v550_v0  ;;  %214 = vst [vmem:[%s638_s6] sm:$0xff] %v551_v14 }
  0x16   : > { %s703_s23 = smov (!%p191_p11, %s192_s23), 1  ;;  %v230_v8 = vand.u32 127, %v229_v7 }
  0x17   : > { %s391_s24 = sshll.u32 %s703_s23, 3 }
  0x18   : > { %s196_s27 = scalar_lea.vmem %s690_s0, %s391_s24  ;;  %s206_s30 = scalar_lea.vmem %s691_s1, %s391_s24 }
  0x19   : > { %v215_v1 = vld [vmem:[%s196_s27] sm:$0xff] }
  0x1a   : > { %v218_v2 = vsel %vm217_vm0, %v215_v1, -inf  ;;  %v216_v3 = vld [vmem:[%s206_s30] sm:$0xff] }
  0x1b   : > { %219 = vmax.xlane.f32.xlu0 %v218_v2 }
  0x31   : > { %232 = vperm.xlu0 %467, %v216_v3  }
  0xa4   : > { %v220_v4 = vpop.xlane.xlu0 %219 }
  0xa5   : > { %v221_v5 = vsub.f32 %v215_v1, %v220_v4 }
  0xa7   : > { %v222_v6 = vmul.f32 1.442695, %v221_v5 }
  0xa9   : > { %468 = vpow2.f32 %v222_v6 }
  0xac   : > { %v233_v9 = vpop.permute.xlu0 %232 }
  0xad   : > { %vm234_vm1 = vcmp.eq.s32.totalorder %v230_v8, %v233_v9 }
  0xae   : > { %v235_v11 = vsel %vm234_vm1, %v215_v1, 0.0 }
  0xaf   : > { %v236_v13 = vsel %vm217_vm0, %v235_v11, 0.0 }
  0xb6   : > { %v469_v10 = vpop.eup %468 }
  0xb7   : > { %v224_v12 = vsel %vm217_vm0, %v469_v10, 0.0 }
  0xb8   : > { %225 = vadd.xlane.f32.xlu1 %v224_v12 }
  0xbc   : > { %237 = vadd.xlane.f32.xlu1 %v236_v13 }
 0x141   : > { %v226_v15 = vpop.xlane.xlu1 %225 }
 0x142   : > { %470 = vlog2.f32 %v226_v15 }
 0x145   : > { %v238_v18 = vpop.xlane.xlu1 %237 }
 0x14f   : > { %v471_v16 = vpop.eup %470 }
 0x150   : > { %v228_v17 = vmul.f32 0.6931472, %v471_v16  ;;  %248 = sbr.rel (%p397_p12) target bundleno = 547 (0x223), region = 36 }
 0x152   : > { %v239_v19 = vadd.f32 %v228_v17, %v220_v4 }
 0x154   : > { %v240_v20 = vsub.f32 %v239_v19, %v238_v18 }
 0x155   : > { %vm250_vm2 = vcmask 7168   ;;  %v249_v29 = vld [vmem:[%s638_s6] sm:$0xff] }
 0x156   : > { %v251_v21 = vsel %vm250_vm2, %v240_v20, 0.0 }
 0x157   : > { %252 = vadd.xlane.f32.xlu0 %v251_v21 }
 0x1e0   : > { %v253_v22 = vpop.xlane.xlu0 %252 }
 0x1e1   : > { %v254_v23 = vrot.slane %v253_v22, 4 }
 0x1e3   : > { %v255_v24 = vadd.f32 %v254_v23, %v253_v22 }
 0x1e5   : > { %v256_v25 = vrot.slane %v255_v24, 2 }
 0x1e7   : > { %v257_v26 = vadd.f32 %v256_v25, %v255_v24 }
 0x1e9   : > { %v258_v27 = vrot.slane %v257_v26, 1 }
 0x1eb   : > { %v259_v28 = vadd.f32 %v258_v27, %v257_v26 }
 0x1ed   : > { %406 = vpush %v259_v28 }
 0x21e   : > { %s407_s8 = spop %406 }
 0x21f   : > { %v261_v30 = vstv %s407_s8 }
 0x220   : > { %v262_v31 = vadd.f32 %v261_v30, %v249_v29 }
 0x222   : > { %263 = vst [vmem:[%s638_s6] sm:$0xff] %v262_v31 }
 0x223 PF: > { %p398_p13 = scmp.le.s32.totalorder %s405_s7, 12 }
 0x225   : > { %266 = sbr.rel (%p398_p13) target bundleno = 765 (0x2fd), region = 40 }
 0x22a   : > { %v268_v32 = vshrl.u32 %v229_v7, 7  ;;  %v270_v33 = vstv %s404_s5  ;;  %vm275_vm3 = vcmask 7168   ;;  %v274_v44 = vld [vmem:[%s638_s6] sm:$0xff] }
 0x22c   : > { %v271_v34 = vadd.s32 %v270_v33, %v268_v32 }
 0x22e   : > { %vm272_vm4 = vcmp.lt.s32.totalorder %v271_v34, 12 }
 0x22f   : > { %v273_v35 = vsel %vm272_vm4, %v240_v20, 0.0 }
 0x230   : > { %v276_v36 = vsel %vm275_vm3, %v273_v35, 0.0 }
 0x231   : > { %277 = vadd.xlane.f32.xlu0 %v276_v36 }
 0x2ba   : > { %v278_v37 = vpop.xlane.xlu0 %277 }
 0x2bb   : > { %v279_v38 = vrot.slane %v278_v37, 4 }
 0x2bd   : > { %v280_v39 = vadd.f32 %v279_v38, %v278_v37 }
 0x2bf   : > { %v281_v40 = vrot.slane %v280_v39, 2 }
 0x2c1   : > { %v282_v41 = vadd.f32 %v281_v40, %v280_v39 }
 0x2c3   : > { %v283_v42 = vrot.slane %v282_v41, 1 }
 0x2c5   : > { %v284_v43 = vadd.f32 %v283_v42, %v282_v41 }
 0x2c7   : > { %408 = vpush %v284_v43 }
 0x2f8   : > { %s409_s15 = spop %408 }
 0x2f9   : > { %v286_v45 = vstv %s409_s15 }
 0x2fa   : > { %v287_v46 = vadd.f32 %v286_v45, %v274_v44 }
 0x2fc   : > { %288 = vst [vmem:[%s638_s6] sm:$0xff] %v287_v46 }
 0x2fd PF: > { %s401_s16 = sshll.u32 %s540_s12, 7  ;;  %s303_s24 = sshll.u32 %s638_s6, 4  ;;  %s304_s24 = int_to_ptr.vmem [resolvable:$true] %s303_s24 }
 0x2fe   : > { %s301_s23 = scalar_lea.hbm %s692_s2, %s401_s16  ;;  %s290_s25 = scalar_lea.sflag [#allocation3], %s187_s3 }
 0x2ff   : > { %s472_s26 = scalar_lea.vmem %s304_s24, 128  ;;  %s552_s27 = smov [#allocation2]  }
 0x300   : > { %p473_p0 = scmp.ne.s32.totalorder %s304_s24, %s472_s26  ;;  %s476_s28 = sshll.u32 %s552_s27, 4  ;;  %s477_s28 = int_to_ptr.vmem [resolvable:$false] %s476_s28 }
 0x301   : > { %s478_s29 = scalar_lea.vmem %s477_s28, 256  ;;  %p479_p3 = scmp.lt.s32.totalorder %s304_s24, %s477_s28 }
 0x302   : > { %p474_p1 = pnand %p473_p0, %p608_p4  ;;  %p480_p5 = scmp.lt.s32.totalorder %s478_s29, %s472_s26 }
 0x304   : > { %p475_p2 = pneg %p474_p1  ;;  %p481_p6 = por %p480_p5, %p479_p3 }
 0x306   : > { %p482_p7 = pnand %p481_p6, %p475_p2 }
 0x308   : > { %485 = shalt.err (!%p482_p7)
}
 0x309   : > { %s486_s12 = scalar_lea.hbm %s301_s23, 128  ;;  %s490_s4 = scalar_lea.hbm %s692_s2, 256 }
 0x30a   : > { %p487_p9 = scmp.ne.s32.totalorder %s301_s23, %s486_s12  ;;  %p491_p12 = scmp.lt.s32.totalorder %s301_s23, %s692_s2 }
 0x30b   : > { %p492_p13 = scmp.lt.s32.totalorder %s490_s4, %s486_s12 }
 0x30c   : > { %p488_p10 = pnand %p487_p9, %p608_p4 }
 0x30d   : > { %p493_p0 = por %p492_p13, %p491_p12 }
 0x30e   : > { %p489_p11 = pneg %p488_p10 }
 0x310   : > { %p494_p1 = pnand %p493_p0, %p489_p11 }
 0x312   : > { %497 = shalt.err (!%p494_p1)
}
 0x313   : > { %410 = dma.vmem_to_hbm [thread:$0]  (%p608_p4), %s304_s24, 128, %s301_s23, %s290_s25  }
 0x314 PF: > { %p416_p2 = scmp.ge.s32.totalorder %s548_s14, 2  ;;  %s315_s7 = sand.u32 1, %s528_s9  }
 0x315   : > { %s316_s8 = scalar_lea.sflag [#allocation3], %s315_s7 }
 0x316   : > { %p413_p3 = pnand %p416_p2, %p615_p8 }
 0x318   : > { %p414_p5 = pneg %p413_p3 }
 0x31a   : > { %523 = dma.done.wait (%p414_p5), %s316_s8, 128  }
 0x31b   : > { %525 = vsyncadd (%p414_p5), %s316_s8, 4294967168  ;;  %s15_s14 = sadd.s32 1, %s548_s14   ;;  %s695_s9 = smov %s532_s10 }
 0x31c   : > { %p12_p6 = scmp.ge.s32.totalorder %s15_s14, 4   ;;  %s696_s10 = smov %s536_s11 }
 0x31d   : > { %s697_s11 = smov %s621_s22  ;;  %s698_s12 = smov %s544_s13 }
 0x31e   : > { %s699_s13 = smov %s701_s17  ;;  %14 = sbr.rel (!%p12_p6) target bundleno = 4 (0x4), region = 78 }
 0x323   :  { %321 = vsyncpa [#allocation3], 1 }
 0x324   :  { %323 = vsyncpa [#allocation3 + $0x1], 1 }

</bundles_post_ra>
